<compile_context>
chip_gen: v7x
topology: tpu7x:2x2x1
jax: 0.10.0
libtpu: 0.0.40
codegen_flags: <defaults>
</compile_context>

<pallas_src>
import functools

import jax
import jax.numpy as jnp
from jax import lax
from jax.experimental import pallas as pl
from jax.experimental.pallas import tpu as pltpu


def _head_kernel(x_ref, w_ref, o_ref, *, hp, h):
    # x_ref: (Bb, T, C) bf16 ; w_ref: (C, 3*Hp) bf16 ; o_ref: (Bb, T, H) bf16
    bb, t, c = x_ref.shape

    # Fused q|k|v projection as a single 2-D matmul with M = Bb*T rows.
    x2d = x_ref[...].reshape(bb * t, c)                                  # bf16
    qkv = jnp.dot(x2d, w_ref[...], preferred_element_type=jnp.float32)  # (Bb*T, 3*Hp) f32

    # Hp is a multiple of 128 -> lane-tile aligned column slices.  Slice and
    # cast straight to bf16 (no f32 q/k/v temporaries).  Scale is already
    # folded into Wq at pack time.
    q = qkv[:, :hp].astype(jnp.bfloat16).reshape(bb, t, hp)
    k = qkv[:, hp:2 * hp].astype(jnp.bfloat16).reshape(bb, t, hp)
    v = qkv[:, 2 * hp:].astype(jnp.bfloat16).reshape(bb, t, hp)

    # Attention scores: contract the head dim directly (no materialized k.T).
    s = jnp.einsum("bqh,bkh->bqk", q, k,
                   preferred_element_type=jnp.float32)     # (Bb, T, T) f32

    # Causal mask from a single (T, T) compare, broadcast over the batch block.
    row = lax.broadcasted_iota(jnp.int32, (t, t), 0)
    col = lax.broadcasted_iota(jnp.int32, (t, t), 1)
    s = jnp.where((col <= row)[None, :, :], s, -jnp.inf)

    # Numerically stable softmax in f32; reciprocal on the EUP slot.
    s = s - jnp.max(s, axis=-1, keepdims=True)
    p = jnp.exp(s)
    p = p * pl.reciprocal(jnp.sum(p, axis=-1, keepdims=True), approx=True)

    # Weighted sum of values; drop the zero-padded head columns at the store.
    o = jnp.einsum("bqk,bkh->bqh", p.astype(jnp.bfloat16), v,
                   preferred_element_type=jnp.float32)     # (Bb, T, Hp) f32
    o_ref[...] = o[..., :h].astype(o_ref.dtype)


def pack_head_weights(wq, wk, wv):
    """Init-time pack: Wq*scale | Wk | Wv, each zero-padded to Hp cols, bf16.

    Returns (w_packed (C, 3*Hp) bf16, hp).  Do this ONCE, not per forward.
    """
    c, h = wq.shape
    hp = max(128, ((h + 127) // 128) * 128)
    scale = float(c) ** -0.5  # module scales by embedding dim C, not head_size

    def pad(w):
        return w if hp == h else jnp.pad(w, ((0, 0), (0, hp - h)))

    w = jnp.concatenate([pad(wq * scale), pad(wk), pad(wv)], axis=1)
    return w.astype(jnp.bfloat16), hp


def _default_block_b(B, T):
    """Generation-dependent batch-block heuristic (always divides B)."""
    kind = ""
    try:
        kind = jax.devices()[0].device_kind.lower()
    except Exception:
        pass
    # Projection-matmul row target: 128 on v5e and older (4x128^2 MXU),
    # 256 on v6e / v7x (2x256^2 MXU).
    older = any(v in kind for v in ("v2", "v3", "v4", "v5"))
    row_target = 128 if older else 256

    block_b = min(B, max(1, row_target // max(T, 1)))
    while B % block_b:
        block_b -= 1

    # v7x has 2 TensorCores per chip: keep >= 2 grid steps so the "parallel"
    # batch axis can be sharded across them.
    if "v7" in kind and B >= 2:
        block_b = max(1, min(block_b, B // 2))
        while B % block_b:
            block_b -= 1
    return block_b


@functools.partial(jax.jit, static_argnames=("head_size", "block_b"))
def head_forward(x, w_packed, *, head_size, block_b=None):
    """x: (B, T, C) f32; w_packed: (C, 3*Hp) bf16 from pack_head_weights.

    Returns (B, T, head_size) bf16 (f32 accumulation inside the kernel).
    """
    B, T, C = x.shape
    hp = w_packed.shape[1] // 3
    H = head_size

    if block_b is None:
        block_b = _default_block_b(B, T)
    assert B % block_b == 0, (
        f"block_b={block_b} must divide batch B={B} (no masked tail support)")
    grid_b = B // block_b

    xb = x.astype(jnp.bfloat16)
    kernel = functools.partial(_head_kernel, hp=hp, h=H)

    return pl.pallas_call(
        kernel,
        out_shape=jax.ShapeDtypeStruct((B, T, H), jnp.bfloat16),
        grid_spec=pltpu.PrefetchScalarGridSpec(
            num_scalar_prefetch=0,
            grid=(grid_b,),
            in_specs=[
                pl.BlockSpec((block_b, T, C), lambda b: (b, 0, 0)),
                # Constant index_map -> weights stay resident across batch steps.
                pl.BlockSpec((C, 3 * hp), lambda b: (0, 0)),
            ],
            # Last dim == full array dim (H), so the <128-lane block is legal;
            # masked stores beat an extra full HBM pass to drop the pad.
            out_specs=pl.BlockSpec((block_b, T, H), lambda b: (b, 0, 0)),
        ),
        compiler_params=pltpu.CompilerParams(
            dimension_semantics=("parallel",),
        ),
    )(xb, w_packed)


def head_reference(x, wq, wk, wv):
    """Pure-JAX f32 reference (mirrors the PyTorch forward in eval mode)."""
    B, T, C = x.shape
    q = x @ wq
    k = x @ wk
    v = x @ wv
    wei = jnp.einsum("bth,bsh->bts", q, k) * (C ** -0.5)
    row = jnp.arange(T)[:, None]
    col = jnp.arange(T)[None, :]
    wei = jnp.where(col <= row, wei, -jnp.inf)
    wei = jax.nn.softmax(wei, axis=-1)
    return jnp.einsum("bts,bsh->bth", wei, v)


if __name__ == "__main__":
    # Shapes consistent with the module: n_embd=384 (fixed), T=8 <= block_size=256,
    # head_size=64, batch=2.
    B, T, C, H = 2, 8, 384, 64

    key = jax.random.PRNGKey(0)
    kx, kq, kk, kv = jax.random.split(key, 4)

    x = jax.random.normal(kx, (B, T, C), dtype=jnp.float32)
    bound = 1.0 / (C ** 0.5)
    wq = jax.random.uniform(kq, (C, H), jnp.float32, -bound, bound)
    wk = jax.random.uniform(kk, (C, H), jnp.float32, -bound, bound)
    wv = jax.random.uniform(kv, (C, H), jnp.float32, -bound, bound)

    # Init-time weight pack (scale folded into Wq, bf16, Hp-padded columns).
    w_packed, _ = pack_head_weights(wq, wk, wv)

    out = head_forward(x, w_packed, head_size=H)
    out = jax.block_until_ready(out)

    ref = head_reference(x, wq, wk, wv)
    assert out.shape == (B, T, H)
    out_f32 = out.astype(jnp.float32)
    max_err = float(jnp.max(jnp.abs(out_f32 - ref)))
    # bf16 MXU operands + bf16 output with f32 accumulation -> loosened tolerance.
    assert jnp.allclose(out_f32, ref, atol=4e-2, rtol=4e-2), (
        f"mismatch vs reference (max abs err {max_err})"
    )

    print("KERNEL_OK")
</pallas_src>

<mosaic_0001>
module attributes {stable_mosaic.version = 11 : i64} {
  func.func @_head_kernel(%arg0: i32, %arg1: memref<2x8x384xbf16, #tpu.memory_space<vmem>>, %arg2: memref<384x384xbf16, #tpu.memory_space<vmem>>, %arg3: memref<2x8x64xbf16, #tpu.memory_space<vmem>>) attributes {dimension_semantics = [#tpu.dimension_semantics<parallel>], iteration_bounds = array<i64: 1>, scalar_prefetch = 0 : i64, scratch_operands = 0 : i64, tpu.core_type = #tpu.core_type<tc>, window_params = [{transform_indices = @transform_0, window_bounds = array<i64: 2, 8, 384>}, {pipeline_mode = #tpu.pipeline_mode<synchronous>, transform_indices = @transform_1, window_bounds = array<i64: 384, 384>}, {transform_indices = @transform_2, window_bounds = array<i64: 2, 8, 64>}]} {
    %c0 = arith.constant 0 : index
    %c0_0 = arith.constant 0 : index
    %c0_1 = arith.constant 0 : index
    %0 = vector.load %arg1[%c0, %c0_0, %c0_1] : memref<2x8x384xbf16, #tpu.memory_space<vmem>>, vector<2x8x384xbf16>
    %1 = vector.shape_cast %0 : vector<2x8x384xbf16> to vector<16x384xbf16>
    %c0_2 = arith.constant 0 : index
    %c0_3 = arith.constant 0 : index
    %2 = vector.load %arg2[%c0_2, %c0_3] : memref<384x384xbf16, #tpu.memory_space<vmem>>, vector<384x384xbf16>
    %cst = arith.constant dense<0.000000e+00> : vector<16x384xf32>
    %3 = tpu.matmul %1, %2, %cst {dimension_numbers = #tpu.dot_dimension_numbers<[1], [0], [0], [1], [0, 0, 1, 1], [], []>} : vector<16x384xbf16>, vector<384x384xbf16>, vector<16x384xf32> -> vector<16x384xf32>
    %4 = vector.extract_strided_slice %3 {offsets = [0, 0], sizes = [16, 128], strides = [1, 1]} : vector<16x384xf32> to vector<16x128xf32>
    %5 = arith.truncf %4 : vector<16x128xf32> to vector<16x128xbf16>
    %6 = vector.shape_cast %5 : vector<16x128xbf16> to vector<2x8x128xbf16>
    %7 = vector.extract_strided_slice %3 {offsets = [0, 128], sizes = [16, 128], strides = [1, 1]} : vector<16x384xf32> to vector<16x128xf32>
    %8 = arith.truncf %7 : vector<16x128xf32> to vector<16x128xbf16>
    %9 = vector.shape_cast %8 : vector<16x128xbf16> to vector<2x8x128xbf16>
    %10 = vector.extract_strided_slice %3 {offsets = [0, 256], sizes = [16, 128], strides = [1, 1]} : vector<16x384xf32> to vector<16x128xf32>
    %11 = arith.truncf %10 : vector<16x128xf32> to vector<16x128xbf16>
    %12 = vector.shape_cast %11 : vector<16x128xbf16> to vector<2x8x128xbf16>
    "tpu.trace_start"() <{level = 10 : i32, message = "bqh,bkh->bqk"}> : () -> ()
    %cst_4 = arith.constant dense<0.000000e+00> : vector<2x8x8xf32>
    %13 = tpu.matmul %6, %9, %cst_4 {dimension_numbers = #tpu.dot_dimension_numbers<[2], [2], [1], [1], [0, 0, 0, 1, 1, 1], [0], [0]>} : vector<2x8x128xbf16>, vector<2x8x128xbf16>, vector<2x8x8xf32> -> vector<2x8x8xf32>
    "tpu.trace_stop"() : () -> ()
    %14 = tpu.iota {dimensions = array<i32: 0>} : vector<8x8xi32>
    %15 = tpu.iota {dimensions = array<i32: 1>} : vector<8x8xi32>
    %16 = arith.cmpi sle, %15, %14 : vector<8x8xi32>
    %17 = vector.shape_cast %16 : vector<8x8xi1> to vector<1x8x8xi1>
    %cst_5 = arith.constant 0xFF800000 : f32
    %18 = vector.shape_cast %17 : vector<1x8x8xi1> to vector<1x8x8xi1>
    %19 = vector.broadcast %18 : vector<1x8x8xi1> to vector<2x8x8xi1>
    %20 = vector.broadcast %cst_5 : f32 to vector<2x8x8xf32>
    %21 = arith.select %19, %13, %20 : vector<2x8x8xi1>, vector<2x8x8xf32>
    %cst_6 = arith.constant dense<0xFF800000> : vector<2x8xf32>
    %22 = vector.multi_reduction <maximumf>, %21, %cst_6 [2] : vector<2x8x8xf32> to vector<2x8xf32>
    %23 = vector.shape_cast %22 : vector<2x8xf32> to vector<2x8x1xf32>
    %24 = vector.broadcast %23 : vector<2x8x1xf32> to vector<2x8x8xf32>
    %25 = arith.subf %21, %24 : vector<2x8x8xf32>
    %26 = math.exp %25 : vector<2x8x8xf32>
    %cst_7 = arith.constant dense<0.000000e+00> : vector<2x8xf32>
    %27 = vector.multi_reduction <add>, %26, %cst_7 [2] : vector<2x8x8xf32> to vector<2x8xf32>
    %28 = vector.shape_cast %27 : vector<2x8xf32> to vector<2x8x1xf32>
    %29 = tpu.reciprocal %28 {approx = true} : vector<2x8x1xf32> -> vector<2x8x1xf32>
    %30 = vector.broadcast %29 : vector<2x8x1xf32> to vector<2x8x8xf32>
    %31 = arith.mulf %26, %30 : vector<2x8x8xf32>
    %32 = arith.truncf %31 : vector<2x8x8xf32> to vector<2x8x8xbf16>
    "tpu.trace_start"() <{level = 10 : i32, message = "bqk,bkh->bqh"}> : () -> ()
    %cst_8 = arith.constant dense<0.000000e+00> : vector<2x8x128xf32>
    %33 = tpu.matmul %32, %12, %cst_8 {dimension_numbers = #tpu.dot_dimension_numbers<[2], [1], [1], [2], [0, 0, 0, 1, 1, 2], [0], [0]>} : vector<2x8x8xbf16>, vector<2x8x128xbf16>, vector<2x8x128xf32> -> vector<2x8x128xf32>
    "tpu.trace_stop"() : () -> ()
    %34 = vector.extract_strided_slice %33 {offsets = [0, 0, 0], sizes = [2, 8, 64], strides = [1, 1, 1]} : vector<2x8x128xf32> to vector<2x8x64xf32>
    %35 = arith.truncf %34 : vector<2x8x64xf32> to vector<2x8x64xbf16>
    %c0_9 = arith.constant 0 : index
    %c0_10 = arith.constant 0 : index
    %c0_11 = arith.constant 0 : index
    %36 = vector.load %arg3[%c0_9, %c0_10, %c0_11] : memref<2x8x64xbf16, #tpu.memory_space<vmem>>, vector<2x8x64xbf16>
    tpu.vector_store %arg3[%c0_9, %c0_10, %c0_11], %35 {strides = array<i32>} : memref<2x8x64xbf16, #tpu.memory_space<vmem>>, vector<2x8x64xbf16>,
    return
  }
  func.func @transform_0(%arg0: i32) -> (i32, i32, i32) {
    %c0_i32 = arith.constant 0 : i32
    %c0_i32_0 = arith.constant 0 : i32
    %c0_i32_1 = arith.constant 0 : i32
    return %arg0, %c0_i32, %c0_i32_0 : i32, i32, i32
  }
  func.func @transform_1(%arg0: i32) -> (i32, i32) {
    %c0_i32 = arith.constant 0 : i32
    %c0_i32_0 = arith.constant 0 : i32
    %c0_i32_1 = arith.constant 0 : i32
    return %c0_i32, %c0_i32_0 : i32, i32
  }
  func.func @transform_2(%arg0: i32) -> (i32, i32, i32) {
    %c0_i32 = arith.constant 0 : i32
    %c0_i32_0 = arith.constant 0 : i32
    %c0_i32_1 = arith.constant 0 : i32
    return %arg0, %c0_i32, %c0_i32_0 : i32, i32, i32
  }
}

</mosaic_0001>

<bundles_post_ra>
// kernel: head_forward.1
= control target key start
LH: loop header
LB: loop body
LE: loop exit
PB: predicated region body
PF: predicated region fallthrough
CT: control target
= control target key end

     0   :  { %7 = vsyncpa [#allocation3], 0  ;;  %s1372_s0 = inlined_call_operand.vmem [shape: bf16[2,8,384], index: 0, kind: input, shape index: {}]   ;;  %s1373_s1 = inlined_call_operand.hbm [shape: bf16[384,384], index: 1, kind: input, shape index: {}]   ;;  %s1374_s2 = inlined_call_operand.hbm [shape: bf16[2,8,64], index: 2, kind: output, shape index: {}]  }
   0x1   :  { %8 = vsyncpa [#allocation4], 0  ;;  %s1287_s9 = smov [#allocation2]   ;;  %s1239_s13 = scalar_lea.hbm %s1373_s1, 9216 }
   0x2   :  { %s16_s10 = sshll.u32 %s1287_s9, 4  ;;  %p1240_p0 = scmp.ne.s32.totalorder %s1373_s1, %s1239_s13  ;;  %s17_s10 = int_to_ptr.vmem [resolvable:$true] %s16_s10 }
   0x3   :  { %p1243_p1 = scmp.lt.u32.totalorder %s1239_s13, %s1373_s1 }
   0x5   :  { %p1245_p2 = pnand %p1243_p1, %p1240_p0 }
   0x7   :  { %1248 = shalt.err (!%p1245_p2)
}
   0x8   :  { %s1249_s18 = scalar_lea.vmem %s17_s10, 9216  ;;  %p1254_p4 = scmp.lt.s32.totalorder %s17_s10, %s17_s10 }
   0x9   :  { %p1250_p3 = scmp.ne.s32.totalorder %s17_s10, %s1249_s18  ;;  %p1255_p5 = scmp.lt.s32.totalorder %s1249_s18, %s1249_s18 }
   0xb   :  { %p1256_p6 = por %p1255_p5, %p1254_p4 }
   0xd   :  { %p1257_p7 = pnand %p1256_p6, %p1250_p3 }
   0xf   :  { %1260 = shalt.err (!%p1257_p7)
}
  0x10   :  { %s1288_s19 = smov 192   ;;  %s1289_s20 = smov 12  }
  0x11   :  { %22 = dma.hbm_to_vmem [thread:$0]  %s1373_s1, 9216, %s17_s10, [#allocation3], %s1288_s19, %s1288_s19, %s1289_s20  }
  0x12   :  { %1283 = dma.done.wait [#allocation3], 9216  }
  0x13   :  { %1284 = vsyncadd [#allocation3], 4294958080  ;;  %v1131_v0 = vld [vmem:[#allocation2 + $0x4] ss:$12 sps:$4 sm:$0xff]   ;;  %v1133_v1 = vld [vmem:[#allocation2] ss:$12 sps:$4 sm:$0xff]  }
  0x14   :  { %527 = vmatprep.subr.bf16.mxu0 %v1131_v0  ;;  %v1134_v2 = vld [vmem:[#allocation2 + $0x1c] ss:$12 sps:$4 sm:$0xff]   ;;  %v1136_v3 = vld [vmem:[#allocation2 + $0x18] ss:$12 sps:$4 sm:$0xff]   ;;  %v1137_v4 = vld [vmem:[#allocation2 + $0x34] ss:$12 sps:$4 sm:$0xff]  }
  0x15   :  { %528 = vmatpush1.bf16.msra.mxu0 %v1133_v1  ;;  %v1139_v5 = vld [vmem:[#allocation2 + $0x30] ss:$12 sps:$4 sm:$0xff]   ;;  %v1140_v6 = vld [vmem:[#allocation2 + $0x4c] ss:$12 sps:$4 sm:$0xff]   ;;  %v1142_v7 = vld [vmem:[#allocation2 + $0x48] ss:$12 sps:$4 sm:$0xff]  }
  0x16   :  { %529 = vmatprep.subr.bf16.mxu0 %v1134_v2  ;;  %v1143_v8 = vld [vmem:[#allocation2 + $0x64] ss:$12 sps:$4 sm:$0xff]   ;;  %v1145_v9 = vld [vmem:[#allocation2 + $0x60] ss:$12 sps:$4 sm:$0xff]   ;;  %v1146_v10 = vld [vmem:[#allocation2 + $0x7c] ss:$12 sps:$4 sm:$0xff]  }
  0x17   :  { %v1148_v11 = vld [vmem:[#allocation2 + $0x78] ss:$12 sps:$4 sm:$0xff]   ;;  %v1149_v12 = vld [vmem:[#allocation2 + $0x94] ss:$12 sps:$4 sm:$0xff]   ;;  %v1151_v14 = vld [vmem:[#allocation2 + $0x90] ss:$12 sps:$4 sm:$0xff]  }
  0x18   :  { %v1181_v13 = vld [vmem:[%s1372_s0 + $0x4] ss:$12 sps:$4 sm:$0xff]   ;;  %v1152_v15 = vld [vmem:[#allocation2 + $0xac] ss:$12 sps:$4 sm:$0xff]   ;;  %v1154_v16 = vld [vmem:[#allocation2 + $0xa8] ss:$12 sps:$4 sm:$0xff]  }
  0x19   :  { %530 = vmatpush1.bf16.msra.mxu0 %v1136_v3  ;;  %559 = vmatprep.mubr.bf16.mxu0 %v1181_v13  ;;  %v1155_v17 = vld [vmem:[#allocation2 + $0xc4] ss:$12 sps:$4 sm:$0xff]   ;;  %v1157_v18 = vld [vmem:[#allocation2 + $0xc0] ss:$12 sps:$4 sm:$0xff]   ;;  %v1158_v19 = vld [vmem:[#allocation2 + $0xdc] ss:$12 sps:$4 sm:$0xff]  }
  0x1a   :  { %531 = vmatprep.subr.bf16.mxu0 %v1137_v4  ;;  %645 = vmatprep.mubr.bf16.mxu1 %v1181_v13  ;;  %v1160_v20 = vld [vmem:[#allocation2 + $0xd8] ss:$12 sps:$4 sm:$0xff]   ;;  %v1161_v21 = vld [vmem:[#allocation2 + $0xf4] ss:$12 sps:$4 sm:$0xff]   ;;  %v1163_v24 = vld [vmem:[#allocation2 + $0xf0] ss:$12 sps:$4 sm:$0xff]  }
  0x1b   :  { %v1207_v22 = vld [vmem:[#allocation2 + $0xc8] ss:$12 sps:$4 sm:$0xff]   ;;  %v1209_v25 = vld [vmem:[#allocation2 + $0xe0] ss:$12 sps:$4 sm:$0xff]   ;;  %v1211_v27 = vld [vmem:[#allocation2 + $0xf8] ss:$12 sps:$4 sm:$0xff]  }
  0x1c   :  { %v1208_v23 = vld [vmem:[#allocation2 + $0x8] ss:$12 sps:$4 sm:$0xff]   ;;  %1035 = vmatprep.subr.bf16.mxu1 %v1207_v22  ;;  %v1210_v26 = vld [vmem:[#allocation2 + $0x20] ss:$12 sps:$4 sm:$0xff]   ;;  %v1212_v30 = vld [vmem:[#allocation2 + $0x38] ss:$12 sps:$4 sm:$0xff]  }
  0x1d   :  { %532 = vmatpush1.bf16.msra.mxu0 %v1139_v5  ;;  %1036 = vmatpush3.bf16.msra.mxu1 %v1208_v23  ;;  %v1164_v28 = vld [vmem:[#allocation2 + $0x10c] ss:$12 sps:$4 sm:$0xff]   ;;  %v1166_v29 = vld [vmem:[#allocation2 + $0x108] ss:$12 sps:$4 sm:$0xff]   ;;  %v1213_v31 = vld [vmem:[#allocation2 + $0x110] ss:$12 sps:$4 sm:$0xff]  }
  0x1e   :  { %533 = vmatprep.subr.bf16.mxu0 %v1140_v6  ;;  %1037 = vmatprep.subr.bf16.mxu1 %v1209_v25  ;;  %v1167_v32 = vld [vmem:[#allocation2 + $0x124] ss:$12 sps:$4 sm:$0xff]   ;;  %v1169_v33 = vld [vmem:[#allocation2 + $0x120] ss:$12 sps:$4 sm:$0xff]   ;;  %v1215_v35 = vld [vmem:[#allocation2 + $0x128] ss:$12 sps:$4 sm:$0xff]  }
  0x1f   :  { %v1214_v34 = vld [vmem:[#allocation2 + $0x50] ss:$12 sps:$4 sm:$0xff]   ;;  %v1172_v37 = vld [vmem:[#allocation2 + $0x138] ss:$12 sps:$4 sm:$0xff]   ;;  %v1216_v38 = vld [vmem:[#allocation2 + $0x68] ss:$12 sps:$4 sm:$0xff]  }
  0x20   :  { %v1170_v36 = vld [vmem:[#allocation2 + $0x13c] ss:$12 sps:$4 sm:$0xff]   ;;  %v1217_v39 = vld [vmem:[#allocation2 + $0x140] ss:$12 sps:$4 sm:$0xff]   ;;  %v1219_v43 = vld [vmem:[#allocation2 + $0x158] ss:$12 sps:$4 sm:$0xff]  }
  0x21   :  { %534 = vmatpush1.bf16.msra.mxu0 %v1142_v7  ;;  %1038 = vmatpush3.bf16.msra.mxu1 %v1210_v26  ;;  %v1173_v40 = vld [vmem:[#allocation2 + $0x154] ss:$12 sps:$4 sm:$0xff]   ;;  %v1175_v41 = vld [vmem:[#allocation2 + $0x150] ss:$12 sps:$4 sm:$0xff]   ;;  %v1176_v44 = vld [vmem:[#allocation2 + $0x16c] ss:$12 sps:$4 sm:$0xff]  }
  0x22   :  { %535 = vmatprep.subr.bf16.mxu0 %v1143_v8  ;;  %1039 = vmatprep.subr.bf16.mxu1 %v1211_v27  ;;  %v1218_v42 = vld [vmem:[#allocation2 + $0x80] ss:$12 sps:$4 sm:$0xff]   ;;  %v1220_v45 = vld [vmem:[#allocation2 + $0x98] ss:$12 sps:$4 sm:$0xff]   ;;  %v1178_v46 = vld [vmem:[#allocation2 + $0x168] ss:$12 sps:$4 sm:$0xff]  }
  0x23   :  { %v1221_v47 = vld [vmem:[#allocation2 + $0x170] ss:$12 sps:$4 sm:$0xff]   ;;  %v1179_v49 = vld [vmem:[%s1372_s0] ss:$12 sps:$4 sm:$0xff]   ;;  %v1223_v53 = vld [vmem:[#allocation2 + $0x188] ss:$12 sps:$4 sm:$0xff]  }
  0x24   :  { %v1184_v48 = vld [vmem:[#allocation2 + $0x184] ss:$12 sps:$4 sm:$0xff]   ;;  %v1182_v51 = vld [vmem:[#allocation2 + $0x180] ss:$12 sps:$4 sm:$0xff]   ;;  %v1187_v52 = vld [vmem:[#allocation2 + $0x19c] ss:$12 sps:$4 sm:$0xff]  }
  0x25   :  { %536 = vmatpush1.bf16.msra.mxu0 %v1145_v9  ;;  %1040 = vmatpush3.bf16.msra.mxu1 %v1212_v30  ;;  %v1222_v50 = vld [vmem:[#allocation2 + $0xb0] ss:$12 sps:$4 sm:$0xff]   ;;  %v1185_v54 = vld [vmem:[#allocation2 + $0x198] ss:$12 sps:$4 sm:$0xff]   ;;  %v1290_v55 = vmov 0   ;;  %v1291_v57 = vmov 0.0  }
  0x26   :  { %537 = vmatprep.subr.bf16.mxu0 %v1146_v10  ;;  %1041 = vmatprep.subr.bf16.mxu1 %v1213_v31  ;;  %v1190_v56 = vld [vmem:[#allocation2 + $0x1b4] ss:$12 sps:$4 sm:$0xff]   ;;  %vm1292_vm0 = vmmov 0   ;;  %v1188_v59 = vld [vmem:[#allocation2 + $0x1b0] ss:$12 sps:$4 sm:$0xff]   ;;  %vm834_vm1 = vcmask 1043456  }
  0x27   :  { %v1224_v58 = vld [vmem:[#allocation2 + $0x1a0] ss:$12 sps:$4 sm:$0xff]   ;;  %v1225_v61 = vld [vmem:[#allocation2 + $0x1b8] ss:$12 sps:$4 sm:$0xff]   ;;  %v1191_v62 = vld [vmem:[#allocation2 + $0x1c8] ss:$12 sps:$4 sm:$0xff]  }
  0x28   :  { %v1193_v60 = vld [vmem:[#allocation2 + $0x1cc] ss:$12 sps:$4 sm:$0xff]   ;;  %v1196_v63 = vld [vmem:[#allocation2 + $0x1e4] ss:$12 sps:$4 sm:$0xff]   ;;  %v1199_v2 = vld [vmem:[#allocation2 + $0x1fc] ss:$12 sps:$4 sm:$0xff]  }
  0x29   :  { %538 = vmatpush1.bf16.msra.mxu0 %v1148_v11  ;;  %1042 = vmatpush3.bf16.msra.mxu1 %v1214_v34  ;;  %v1226_v0 = vld [vmem:[#allocation2 + $0x1d0] ss:$12 sps:$4 sm:$0xff]   ;;  %v1194_v1 = vld [vmem:[#allocation2 + $0x1e0] ss:$12 sps:$4 sm:$0xff]   ;;  %v1227_v3 = vld [vmem:[#allocation2 + $0x1e8] ss:$12 sps:$4 sm:$0xff]  }
  0x2a   :  { %539 = vmatprep.subr.bf16.mxu0 %v1149_v12  ;;  %1043 = vmatprep.subr.bf16.mxu1 %v1215_v35  ;;  %v1197_v4 = vld [vmem:[#allocation2 + $0x1f8] ss:$12 sps:$4 sm:$0xff]   ;;  %v1202_v5 = vld [vmem:[#allocation2 + $0x214] ss:$12 sps:$4 sm:$0xff]   ;;  %v1200_v7 = vld [vmem:[#allocation2 + $0x210] ss:$12 sps:$4 sm:$0xff]  }
  0x2b   :  { %v1228_v6 = vld [vmem:[#allocation2 + $0x200] ss:$12 sps:$4 sm:$0xff]   ;;  %v1229_v9 = vld [vmem:[#allocation2 + $0x218] ss:$12 sps:$4 sm:$0xff]   ;;  %v1203_v10 = vld [vmem:[#allocation2 + $0x228] ss:$12 sps:$4 sm:$0xff]  }
  0x2c   :  { %v1205_v8 = vld [vmem:[#allocation2 + $0x22c] ss:$12 sps:$4 sm:$0xff]   ;;  %v1206_v11 = vld [vmem:[%s1372_s0 + $0x8] ss:$12 sps:$4 sm:$0xff]   ;;  %v1230_v12 = vld [vmem:[#allocation2 + $0x230] ss:$12 sps:$4 sm:$0xff]  }
  0x2d   :  { %540 = vmatpush1.bf16.msra.mxu0 %v1151_v14  ;;  %1044 = vmatpush3.bf16.msra.mxu1 %v1216_v38  ;;  %vm806_vm3 = vcmask 64512   ;;  %vm926_vm4 = vcmask 519168   ;;  %s1293_s0 = smov [#allocation5]  }
  0x2e   :  { %541 = vmatprep.subr.bf16.mxu0 %v1152_v15  ;;  %1045 = vmatprep.subr.bf16.mxu1 %v1217_v39  ;;  %s934_s28 = sshll.u32 %s1293_s0, 4  ;;  %s935_s28 = int_to_ptr.vmem [resolvable:$true] %s934_s28 }
  0x2f   :  { %s1261_s29 = scalar_lea.vmem %s935_s28, 128  ;;  %p1266_p9 = scmp.lt.s32.totalorder %s935_s28, %s935_s28 }
  0x30   :  { %p1262_p8 = scmp.ne.s32.totalorder %s935_s28, %s1261_s29  ;;  %p1267_p10 = scmp.lt.s32.totalorder %s1261_s29, %s1261_s29 }
  0x31   :  { %542 = vmatpush1.bf16.msra.mxu0 %v1154_v16  ;;  %1046 = vmatpush3.bf16.msra.mxu1 %v1218_v42 }
  0x32   :  { %543 = vmatprep.subr.bf16.mxu0 %v1155_v17  ;;  %1047 = vmatprep.subr.bf16.mxu1 %v1219_v43  ;;  %p1268_p11 = por %p1267_p10, %p1266_p9 }
  0x34   :  { %p1269_p12 = pnand %p1268_p11, %p1262_p8 }
  0x35   :  { %544 = vmatpush1.bf16.msra.mxu0 %v1157_v18  ;;  %1048 = vmatpush3.bf16.msra.mxu1 %v1220_v45 }
  0x36   :  { %545 = vmatprep.subr.bf16.mxu0 %v1158_v19  ;;  %1049 = vmatprep.subr.bf16.mxu1 %v1221_v47 }
  0x39   :  { %546 = vmatpush1.bf16.msra.mxu0 %v1160_v20  ;;  %1050 = vmatpush3.bf16.msra.mxu1 %v1222_v50 }
  0x3a   :  { %547 = vmatprep.subr.bf16.mxu0 %v1161_v21  ;;  %1074 = vmatprep.subr.bf16.mxu1 %v1291_v57 }
  0x3c   :  { %646 = vmatmul.mubr.bf16.vlgmr.msra.gmra.mrb[0].mxu1 %v1179_v49 }
  0x3d   :  { %548 = vmatpush1.bf16.msra.mxu0 %v1163_v24  ;;  %1075 = vmatpush3.bf16.msra.mxu1 %v1223_v53 }
  0x3e   :  { %549 = vmatprep.subr.bf16.mxu0 %v1164_v28  ;;  %1090 = vmatprep.mubr.msk.bf16.mxu1 %vm1292_vm0, %v1291_v57 }
  0x3f   :  { %1076 = vmatprep.subr.bf16.mxu1 %v1291_v57 }
  0x41   :  { %550 = vmatpush1.bf16.msra.mxu0 %v1166_v29  ;;  %1077 = vmatpush3.bf16.msra.mxu1 %v1224_v58 }
  0x42   :  { %551 = vmatprep.subr.bf16.mxu0 %v1167_v32  ;;  %1078 = vmatprep.subr.bf16.mxu1 %v1291_v57 }
  0x45   :  { %552 = vmatpush1.bf16.msra.mxu0 %v1169_v33  ;;  %1079 = vmatpush3.bf16.msra.mxu1 %v1225_v61 }
  0x46   :  { %553 = vmatprep.subr.bf16.mxu0 %v1170_v36  ;;  %1080 = vmatprep.subr.bf16.mxu1 %v1291_v57 }
  0x49   :  { %554 = vmatpush1.bf16.msra.mxu0 %v1172_v37  ;;  %1081 = vmatpush3.bf16.msra.mxu1 %v1226_v0  ;;  %v797_v37 = vlaneseq }
  0x4a   :  { %555 = vmatprep.subr.bf16.mxu0 %v1173_v40  ;;  %1082 = vmatprep.subr.bf16.mxu1 %v1291_v57 }
  0x4b   :  { %v798_v38 = vshrl.u32 %v797_v37, 7  ;;  %v800_v39 = vand.u32 127, %v797_v37 }
  0x4d   :  { %556 = vmatpush1.bf16.msra.mxu0 %v1175_v41  ;;  %1083 = vmatpush3.bf16.msra.mxu1 %v1227_v3  ;;  %vm801_vm2 = vcmp.le.s32.totalorder %v800_v39, %v798_v38 }
  0x4e   :  { %557 = vmatprep.subr.bf16.mxu0 %v1176_v44  ;;  %1084 = vmatprep.subr.bf16.mxu1 %v1291_v57 }
  0x51   :  { %558 = vmatpush1.bf16.msra.mxu0 %v1178_v46  ;;  %1085 = vmatpush3.bf16.msra.mxu1 %v1228_v6 }
  0x52   :  { %570 = vmatprep.subr.bf16.mxu0 %v1184_v48  ;;  %1086 = vmatprep.subr.bf16.mxu1 %v1291_v57 }
  0x54   :  { %560 = vmatmul.mubr.bf16.vlgmr.msra.gmra.mrb[0].mxu0 %v1179_v49 }
  0x55   :  { %571 = vmatpush1.bf16.msra.mxu0 %v1182_v51  ;;  %602 = vmatprep.mubr.bf16.mxu0 %v1290_v55 }
  0x56   :  { %572 = vmatprep.subr.bf16.mxu0 %v1187_v52  ;;  %1087 = vmatpush3.bf16.msra.mxu1 %v1229_v9 }
  0x57   :  { %1088 = vmatprep.subr.bf16.mxu1 %v1291_v57 }
  0x59   :  { %573 = vmatpush1.bf16.msra.mxu0 %v1185_v54 }
  0x5a   :  { %574 = vmatprep.subr.bf16.mxu0 %v1190_v56  ;;  %1089 = vmatpush3.bf16.msra.mxu1 %v1230_v12 }
  0x5b   :  { %1094 = vmatprep.subr.bf16.mxu1 %v1291_v57 }
  0x5d   :  { %575 = vmatpush1.bf16.msra.mxu0 %v1188_v59  ;;  %1091 = vmatmul.mubr.bf16.vlgmr.msra.gmra.mrb[4].mxu1 %v1206_v11 }
  0x5e   :  { %576 = vmatprep.subr.bf16.mxu0 %v1193_v60  ;;  %1096 = vmatprep.mubr.msk.bf16.mxu1 %vm1292_vm0, %v1291_v57 }
  0x61   :  { %577 = vmatpush1.bf16.msra.mxu0 %v1191_v62 }
  0x62   :  { %578 = vmatprep.subr.bf16.mxu0 %v1196_v63 }
  0x65   :  { %579 = vmatpush1.bf16.msra.mxu0 %v1194_v1 }
  0x66   :  { %580 = vmatprep.subr.bf16.mxu0 %v1199_v2 }
  0x69   :  { %581 = vmatpush1.bf16.msra.mxu0 %v1197_v4 }
  0x6a   :  { %582 = vmatprep.subr.bf16.mxu0 %v1202_v5 }
  0x6d   :  { %583 = vmatpush1.bf16.msra.mxu0 %v1200_v7 }
  0x6e   :  { %584 = vmatprep.subr.bf16.mxu0 %v1205_v8 }
  0x71   :  { %585 = vmatpush1.bf16.msra.mxu0 %v1203_v10 }
  0x74   :  { %603 = vmatmul.mubr.bf16.vlgmr.msra.gmra.mrb[0].mxu0 %v1206_v11 }
 0x10f   :  { %v1051_v13 = vpop.f32.mrb[0].mxu1 }
 0x110   :  { %v1052_v14 = vpop.f32.mrb[1].mxu1 }
 0x111   :  { %v1053_v15 = vadd.f32 %v1052_v14, %v1051_v13  ;;  %v1054_v16 = vpop.f32.mrb[2].mxu1 }
 0x112   :  { %v1055_v17 = vpop.f32.mrb[3].mxu1 }
 0x113   :  { %v1056_v18 = vadd.f32 %v1055_v17, %v1054_v16 }
 0x130   :  { %v688_v24 = vpop.f32.mrb[4].mxu1 }
 0x131   :  { %v689_v25 = vadd.f32 %v1053_v15, %v688_v24  ;;  %v1092_v26 = vpop.f32.mrb[5].mxu1 }
 0x132   :  { %v691_v27 = vpop.f32.mrb[6].mxu1 }
 0x133   :  { %v692_v28 = vadd.f32 %v1056_v18, %v691_v27  ;;  %v1093_v29 = vpop.f32.mrb[7].mxu1  ;;  %v1033_v34 = vpack.c.bf16 %v689_v25, %v689_v25 }
 0x135   :  { %v1034_v30 = vpack.c.bf16 %v692_v28, %v692_v28  ;;  %v836_v36 = vsel %vm834_vm1, %v1033_v34, 0 }
 0x137   :  { %v882_v33 = vsel %vm834_vm1, %v1034_v30, 0 }
 0x147   :  { %v604_v19 = vpop.f32.mrb[0].mxu0 }
 0x148   :  { %v606_v20 = vpop.f32.mrb[1].mxu0  ;;  %v1029_v31 = vpack.c.bf16 %v604_v19, %v604_v19 }
 0x149   :  { %v1031_v21 = vpack.c.bf16 %v606_v20, %v606_v20  ;;  %v608_v22 = vpop.f32.mrb[2].mxu0 }
 0x14a   :  { %v610_v23 = vpop.f32.mrb[3].mxu0  ;;  %v1030_v35 = vpack.c.bf16 %v608_v22, %v608_v22 }
 0x14b   :  { %1095 = vmatpush3.bf16.xpose.msra.mxu1 %v1031_v21  ;;  %v1032_v32 = vpack.c.bf16 %v610_v23, %v610_v23 }
 0x14c   :  { %1100 = vmatprep.subr.bf16.mxu1 %v1291_v57 }
 0x152   :  { %1097 = vmatmul.mubr.bf16.vlgmr.msra.gmra.mrb[8].mxu1 %v1029_v31 }
 0x153   :  { %1101 = vmatpush3.bf16.xpose.msra.mxu1 %v1032_v32  ;;  %1102 = vmatprep.mubr.msk.bf16.mxu1 %vm1292_vm0, %v1291_v57 }
 0x154   :  { %1106 = vmatprep.subr.bf16.mxu1 %v1291_v57 }
 0x15a   :  { %1103 = vmatmul.mubr.bf16.vlgmr.msra.gmra.mrb[12].mxu1 %v1030_v35 }
 0x15b   :  { %1107 = vmatpush3.bf16.msra.mxu1 %v836_v36  ;;  %1108 = vmatprep.mubr.msk.bf16.mxu1 %vm1292_vm0, %v1291_v57 }
 0x15c   :  { %1112 = vmatprep.subr.bf16.mxu1 %v1291_v57 }
 0x225   :  { %v751_v40 = vpop.f32.mrb[8].mxu1 }
 0x226   :  { %v804_v41 = vsel %vm801_vm2, %v751_v40, -inf  ;;  %v1098_v42 = vpop.f32.mrb[9].mxu1 }
 0x227   :  { %v754_v43 = vpop.f32.mrb[10].mxu1  ;;  %v807_v44 = vsel %vm806_vm3, %v804_v41, -inf }
 0x228   :  { %808 = vmax.xlane.f32.xlu0 %v807_v44  ;;  %v1099_v45 = vpop.f32.mrb[11].mxu1 }
 0x22d   :  { %v791_v46 = vpop.f32.mrb[12].mxu1 }
 0x22e   :  { %v805_v47 = vsel %vm801_vm2, %v791_v46, -inf  ;;  %v1104_v48 = vpop.f32.mrb[13].mxu1 }
 0x22f   :  { %v794_v49 = vpop.f32.mrb[14].mxu1  ;;  %v810_v50 = vsel %vm806_vm3, %v805_v47, -inf }
 0x230   :  { %811 = vmax.xlane.f32.xlu0 %v810_v50  ;;  %v1105_v51 = vpop.f32.mrb[15].mxu1 }
 0x2b5   :  { %v809_v52 = vpop.xlane.xlu0 %808 }
 0x2b6   :  { %v813_v53 = vsub.f32 %v804_v41, %v809_v52 }
 0x2b8   :  { %v815_v54 = vmul.f32 1.442695, %v813_v53 }
 0x2ba   :  { %1231 = vpow2.f32 %v815_v54 }
 0x2bd   :  { %v812_v55 = vpop.xlane.xlu0 %811 }
 0x2be   :  { %v814_v56 = vsub.f32 %v805_v47, %v812_v55 }
 0x2c0   :  { %v817_v58 = vmul.f32 1.442695, %v814_v56 }
 0x2c2   :  { %1233 = vpow2.f32 %v817_v58 }
 0x2c4   :  { %v1232_v59 = vpop.eup %1231 }
 0x2c5   :  { %v819_v60 = vsel %vm806_vm3, %v1232_v59, 0.0 }
 0x2c6   :  { %820 = vadd.xlane.f32.xlu1 %v819_v60 }
 0x2cc   :  { %v1234_v61 = vpop.eup %1233 }
 0x2cd   :  { %v822_v62 = vsel %vm806_vm3, %v1234_v61, 0.0 }
 0x2ce   :  { %823 = vadd.xlane.f32.xlu1 %v822_v62 }
 0x353   :  { %v821_v63 = vpop.xlane.xlu1 %820 }
 0x354   :  { %1235 = vrcp.f32 %v821_v63 }
 0x35b   :  { %v824_v0 = vpop.xlane.xlu1 %823 }
 0x35c   :  { %1237 = vrcp.f32 %v824_v0 }
 0x35e   :  { %v1236_v1 = vpop.eup %1235 }
 0x35f   :  { %v827_v2 = vmul.f32 %v1236_v1, %v1232_v59 }
 0x361   :  { %v829_v3 = vpack.c.bf16 %v827_v2, %v827_v2 }
 0x363   :  { %1109 = vmatmul.mubr.msk.bf16.vlgmr.msra.gmra.mrb[16].mxu1 %vm806_vm3, %v829_v3 }
 0x364   :  { %1113 = vmatpush3.bf16.msra.mxu1 %v882_v33  ;;  %1114 = vmatprep.mubr.msk.bf16.mxu1 %vm1292_vm0, %v1291_v57 }
 0x366   :  { %v1238_v4 = vpop.eup %1237 }
 0x367   :  { %v828_v5 = vmul.f32 %v1238_v4, %v1234_v61 }
 0x369   :  { %v830_v6 = vpack.c.bf16 %v828_v5, %v828_v5 }
 0x36b   :  { %1115 = vmatmul.mubr.msk.bf16.vlgmr.msra.gmra.mrb[20].mxu1 %vm806_vm3, %v830_v6 }
 0x436   :  { %v872_v7 = vpop.f32.mrb[16].mxu1 }
 0x437   :  { %v924_v8 = vpack.c.bf16 %v872_v7, %v872_v7  ;;  %v1110_v9 = vpop.f32.mrb[17].mxu1 }
 0x438   :  { %v875_v10 = vpop.f32.mrb[18].mxu1 }
 0x439   :  { %927 = vst.msk [vmem:[#allocation5] sm:$0xf] %vm926_vm4, %v924_v8  ;;  %v1111_v11 = vpop.f32.mrb[19].mxu1 }
 0x43e   :  { %v918_v12 = vpop.f32.mrb[20].mxu1 }
 0x43f   :  { %v925_v13 = vpack.c.bf16 %v918_v12, %v918_v12  ;;  %v1116_v14 = vpop.f32.mrb[21].mxu1 }
 0x440   :  { %v921_v15 = vpop.f32.mrb[22].mxu1 }
 0x441   :  { %928 = vst.msk [vmem:[#allocation5 + $0x4] sm:$0xf] %vm926_vm4, %v925_v13  ;;  %v1117_v57 = vpop.f32.mrb[23].mxu1 }
 0x442   :  { %1272 = shalt.err (!%p1269_p12)
}
 0x443   :  { %s1273_s4 = scalar_lea.hbm %s1374_s2, 128 }
 0x444   :  { %p1274_p13 = scmp.ne.s32.totalorder %s1374_s2, %s1273_s4  ;;  %p1277_p0 = scmp.lt.u32.totalorder %s1273_s4, %s1374_s2 }
 0x446   :  { %p1279_p1 = pnand %p1277_p0, %p1274_p13 }
 0x448   :  { %1282 = shalt.err (!%p1279_p1)
}
 0x449   :  { %s1294_s9 = smov 64   ;;  %s1295_s10 = smov 4  }
 0x44a   :  { %940 = dma.vmem_to_hbm [thread:$0]  %s935_s28, 128, %s1374_s2, [#allocation4], %s1294_s9, %s1294_s9, %s1295_s10  }
 0x44b   :  { %1285 = dma.done.wait [#allocation4], 128  }
 0x44c   :  { %1286 = vsyncadd [#allocation4], 4294967168 }
 0x44d   :  { %944 = vsyncpa [#allocation3], 1 }
 0x44e   :  { %945 = vsyncpa [#allocation4], 1 }

</bundles_post_ra>
